<compile_context>
chip_gen: v5e
topology: v5e:2x2
jax: 0.10.0
libtpu: 0.0.40
codegen_flags: <defaults>
</compile_context>

<pallas_src>
import functools

import jax
import jax.numpy as jnp
from jax import lax
from jax.experimental import pallas as pl
from jax.experimental.pallas import tpu as pltpu


def _round_up(x, m):
    return ((x + m - 1) // m) * m


def _metric_loss_kernel(
    xi_ref, xj_ref,                       # inputs: row-block i / row-block j of X
    o_ref,                                # output: (1, 1) loss
    acc_ref, d_ref, sumsq_ref, trace_ref, max_ref,   # VMEM scratch
    *, b_true, tile_m, matmul_dtype, eps,
):
    i = pl.program_id(0)
    j = pl.program_id(1)
    k = pl.program_id(2)

    first_step = jnp.logical_and(jnp.logical_and(i == 0, j == 0), k == 0)
    last_k = k == pl.num_programs(2) - 1
    last_step = jnp.logical_and(
        jnp.logical_and(i == pl.num_programs(0) - 1,
                        j == pl.num_programs(1) - 1),
        last_k)

    # ---- one-time init of the streaming accumulators ------------------------
    @pl.when(first_step)
    def _():
        d_ref[...] = jnp.zeros_like(d_ref)
        sumsq_ref[...] = jnp.zeros_like(sumsq_ref)
        trace_ref[...] = jnp.zeros_like(trace_ref)
        max_ref[...] = jnp.full_like(max_ref, -jnp.inf)

    xj = xj_ref[...]                                    # (tm, tk) f32

    # ---- per-row sum of squares (replaces the (B, D) normalization pass) ----
    # Accumulated exactly once per row block, during the i == 0 sweep.
    @pl.when(i == 0)
    def _():
        off = pl.multiple_of(j * tile_m, 8)
        d_ref[pl.ds(off, tile_m), :] += jnp.sum(xj * xj, axis=1, keepdims=True)

    # ---- raw Gram tile: contract dim 1 of both operands (A @ B^T, no .T) ----
    @pl.when(k == 0)
    def _():
        acc_ref[...] = jnp.zeros_like(acc_ref)

    xi_m = xi_ref[...].astype(matmul_dtype)
    xj_m = xj.astype(matmul_dtype)
    acc_ref[...] += lax.dot_general(
        xi_m, xj_m,
        dimension_numbers=(((1,), (1,)), ((), ())),
        preferred_element_type=jnp.float32)

    # ---- tile finalize: normalize the Gram tile + stream max / sum / trace --
    @pl.when(last_k)
    def _():
        g = acc_ref[...]                                # (tm, tm) f32
        row_off = pl.multiple_of(i * tile_m, 8)
        col_off = pl.multiple_of(j * tile_m, 8)
        rs_i = lax.rsqrt(jnp.maximum(d_ref[pl.ds(row_off, tile_m), :], eps))
        rs_j = lax.rsqrt(jnp.maximum(d_ref[pl.ds(col_off, tile_m), :], eps))

        rr = lax.broadcasted_iota(jnp.int32, (tile_m, tile_m), 0)
        cc = lax.broadcasted_iota(jnp.int32, (tile_m, tile_m), 1)
        # Column scaling via diag(rs_j) on the MXU -> no sublane->lane relayout.
        # Cost: a tiny (tm x tm x tm) f32 matmul per tile, negligible vs. the
        # main Gram accumulation over D.
        diag_rs_j = rs_j * (rr == cc).astype(jnp.float32)
        sim = jnp.dot(g * rs_i, diag_rs_j, preferred_element_type=jnp.float32)

        max_ref[...] = jnp.maximum(max_ref[...], jnp.max(sim))
        sumsq_ref[...] += jnp.sum(sim * sim)
        # only entries on the *global* diagonal contribute to the trace
        diag_mask = ((rr + i * tile_m) == (cc + j * tile_m)).astype(jnp.float32)
        trace_ref[...] += jnp.sum(sim * diag_mask)

    # ---- loss finalize (last grid step only) ---------------------------------
    @pl.when(last_step)
    def _():
        bf = float(b_true)
        inv_m = 1.0 / max_ref[...]
        # mean((sim/m - I)^2) == (sum(sim^2)/m^2 - 2*trace(sim)/m + B) / B^2
        o_ref[...] = (sumsq_ref[...] * inv_m * inv_m
                      - 2.0 * trace_ref[...] * inv_m + bf) / (bf * bf)


def metric_loss(X, *, matmul_dtype=jnp.bfloat16, tile_m=None, tile_k=None,
                vmem_limit_bytes=64 * 1024 * 1024):
    """Pallas TPU implementation of MetricLoss.forward (default sim_func)."""
    # TODO(synk): only the default sim_func (plain matmul X @ X.T) is supported.
    X = jnp.asarray(X, jnp.float32)
    B, D = X.shape

    tm = tile_m if tile_m is not None else min(128, _round_up(B, 8))
    tk = tile_k if tile_k is not None else min(512, _round_up(D, 128))
    Bp = _round_up(B, tm)
    Dp = _round_up(D, tk)
    if (Bp, Dp) != (B, D):
        # Zero padding: padded rows get d == 0 and are neutralized by the eps
        # clamp inside the kernel (their sim entries become exactly 0); the
        # final mean uses the true B.
        X = jnp.pad(X, ((0, Bp - B), (0, Dp - D)))
    ni = Bp // tm
    nk = Dp // tk

    kernel = functools.partial(
        _metric_loss_kernel,
        b_true=B, tile_m=tm, matmul_dtype=matmul_dtype, eps=1e-30)

    out = pl.pallas_call(
        kernel,
        out_shape=jax.ShapeDtypeStruct((1, 1), jnp.float32),
        grid_spec=pltpu.PrefetchScalarGridSpec(
            num_scalar_prefetch=0,
            grid=(ni, ni, nk),                  # (row-block i, row-block j, k)
            in_specs=[
                pl.BlockSpec((tm, tk), lambda i, j, k: (i, k)),
                pl.BlockSpec((tm, tk), lambda i, j, k: (j, k)),
            ],
            out_specs=pl.BlockSpec((1, 1), lambda i, j, k: (0, 0)),
            scratch_shapes=[
                pltpu.VMEM((tm, tm), jnp.float32),   # Gram-tile f32 accumulator
                pltpu.VMEM((Bp, 1), jnp.float32),    # per-row sum of squares
                pltpu.VMEM((1, 1), jnp.float32),     # sum(sim^2)
                pltpu.VMEM((1, 1), jnp.float32),     # trace(sim)
                pltpu.VMEM((1, 1), jnp.float32),     # max(sim)
            ],
        ),
        compiler_params=pltpu.CompilerParams(
            # The fused streaming max/sum/trace (and the d scratch) carry state
            # across the i/j axes too, so all three axes must stay sequential.
            dimension_semantics=("arbitrary", "arbitrary", "arbitrary"),
            vmem_limit_bytes=vmem_limit_bytes,
        ),
    )(X, X)
    return out[0, 0]


def _reference(X):
    """Pure-JAX reference mirroring the PyTorch module."""
    Xn = X / jnp.linalg.norm(X, axis=1, keepdims=True)
    sim = Xn @ Xn.T
    sim = sim / jnp.max(sim)
    eye = jnp.eye(X.shape[0], dtype=sim.dtype)
    return jnp.mean((sim - eye) ** 2)


if __name__ == "__main__":
    key = jax.random.PRNGKey(0)
    B, D = 8, 32  # small (batch, hidden) consistent with the (B, D) input
    X = jax.random.normal(key, (B, D), dtype=jnp.float32)

    # f32 MXU path: tight check against the pure-JAX / PyTorch reference.
    loss = metric_loss(X, matmul_dtype=jnp.float32)
    jax.block_until_ready(loss)
    ref = _reference(X)
    assert jnp.allclose(loss, ref, atol=1e-5, rtol=1e-4), (loss, ref)

    # Default bf16 MXU fast path (f32 accumulation): loose check.
    loss_bf16 = metric_loss(X)
    jax.block_until_ready(loss_bf16)
    assert jnp.allclose(loss_bf16, ref, atol=5e-3, rtol=5e-2), (loss_bf16, ref)

    print("KERNEL_OK")
</pallas_src>

<mosaic_0001>
module attributes {stable_mosaic.version = 11 : i64} {
  func.func @_metric_loss_kernel(%arg0: i32, %arg1: i32, %arg2: i32, %arg3: memref<8x128xf32, #tpu.memory_space<vmem>>, %arg4: memref<8x128xf32, #tpu.memory_space<vmem>>, %arg5: memref<1x1xf32, #tpu.memory_space<vmem>>, %arg6: memref<8x8xf32, #tpu.memory_space<vmem>>, %arg7: memref<8x1xf32, #tpu.memory_space<vmem>>, %arg8: memref<1x1xf32, #tpu.memory_space<vmem>>, %arg9: memref<1x1xf32, #tpu.memory_space<vmem>>, %arg10: memref<1x1xf32, #tpu.memory_space<vmem>>) attributes {dimension_semantics = [#tpu.dimension_semantics<arbitrary>, #tpu.dimension_semantics<arbitrary>, #tpu.dimension_semantics<arbitrary>], iteration_bounds = array<i64: 1, 1, 1>, scalar_prefetch = 0 : i64, scratch_operands = 5 : i64, tpu.core_type = #tpu.core_type<tc>, window_params = [{transform_indices = @transform_0, window_bounds = array<i64: 8, 128>}, {transform_indices = @transform_1, window_bounds = array<i64: 8, 128>}, {pipeline_mode = #tpu.pipeline_mode<synchronous>, transform_indices = @transform_2, window_bounds = array<i64: 1, 1>}]} {
    %c0_i32 = arith.constant 0 : i32
    %0 = arith.cmpi eq, %arg0, %c0_i32 : i32
    %c0_i32_0 = arith.constant 0 : i32
    %1 = arith.cmpi eq, %arg1, %c0_i32_0 : i32
    %2 = arith.andi %0, %1 : i1
    %c0_i32_1 = arith.constant 0 : i32
    %3 = arith.cmpi eq, %arg2, %c0_i32_1 : i32
    %4 = arith.andi %2, %3 : i1
    %c0_i32_2 = arith.constant 0 : i32
    %5 = arith.cmpi eq, %arg2, %c0_i32_2 : i32
    %c0_i32_3 = arith.constant 0 : i32
    %6 = arith.cmpi eq, %arg0, %c0_i32_3 : i32
    %c0_i32_4 = arith.constant 0 : i32
    %7 = arith.cmpi eq, %arg1, %c0_i32_4 : i32
    %8 = arith.andi %6, %7 : i1
    %9 = arith.andi %8, %5 : i1
    %10 = arith.extui %4 : i1 to i32
    %c0_i32_5 = arith.constant 0 : i32
    %11 = arith.cmpi ne, %10, %c0_i32_5 : i32
    scf.if %11 {
      %cst_19 = arith.constant 0.000000e+00 : f32
      %28 = vector.broadcast %cst_19 : f32 to vector<8x1xf32>
      %c0_20 = arith.constant 0 : index
      %c0_21 = arith.constant 0 : index
      %29 = vector.load %arg7[%c0_20, %c0_21] : memref<8x1xf32, #tpu.memory_space<vmem>>, vector<8x1xf32>
      tpu.vector_store %arg7[%c0_20, %c0_21], %28 {strides = array<i32>} : memref<8x1xf32, #tpu.memory_space<vmem>>, vector<8x1xf32>,
      %cst_22 = arith.constant 0.000000e+00 : f32
      %30 = vector.broadcast %cst_22 : f32 to vector<1x1xf32>
      %c0_23 = arith.constant 0 : index
      %c0_24 = arith.constant 0 : index
      %31 = vector.load %arg8[%c0_23, %c0_24] : memref<1x1xf32, #tpu.memory_space<vmem>>, vector<1x1xf32>
      tpu.vector_store %arg8[%c0_23, %c0_24], %30 {strides = array<i32>} : memref<1x1xf32, #tpu.memory_space<vmem>>, vector<1x1xf32>,
      %cst_25 = arith.constant 0.000000e+00 : f32
      %32 = vector.broadcast %cst_25 : f32 to vector<1x1xf32>
      %c0_26 = arith.constant 0 : index
      %c0_27 = arith.constant 0 : index
      %33 = vector.load %arg9[%c0_26, %c0_27] : memref<1x1xf32, #tpu.memory_space<vmem>>, vector<1x1xf32>
      tpu.vector_store %arg9[%c0_26, %c0_27], %32 {strides = array<i32>} : memref<1x1xf32, #tpu.memory_space<vmem>>, vector<1x1xf32>,
      %cst_28 = arith.constant 0xFF800000 : f32
      %34 = vector.broadcast %cst_28 : f32 to vector<1x1xf32>
      %c0_29 = arith.constant 0 : index
      %c0_30 = arith.constant 0 : index
      %35 = vector.load %arg10[%c0_29, %c0_30] : memref<1x1xf32, #tpu.memory_space<vmem>>, vector<1x1xf32>
      tpu.vector_store %arg10[%c0_29, %c0_30], %34 {strides = array<i32>} : memref<1x1xf32, #tpu.memory_space<vmem>>, vector<1x1xf32>,
    } else {
    }
    %c0 = arith.constant 0 : index
    %c0_6 = arith.constant 0 : index
    %12 = vector.load %arg4[%c0, %c0_6] : memref<8x128xf32, #tpu.memory_space<vmem>>, vector<8x128xf32>
    %c0_i32_7 = arith.constant 0 : i32
    %13 = arith.cmpi eq, %arg0, %c0_i32_7 : i32
    %14 = arith.extui %13 : i1 to i32
    %c0_i32_8 = arith.constant 0 : i32
    %15 = arith.cmpi ne, %14, %c0_i32_8 : i32
    scf.if %15 {
      %c8_i32 = arith.constant 8 : i32
      %28 = arith.muli %arg1, %c8_i32 : i32
      %29 = tpu.assume_multiple %28, 8 : i32
      %30 = arith.index_cast %29 : i32 to index
      %c0_19 = arith.constant 0 : index
      %31 = vector.load %arg7[%30, %c0_19] : memref<8x1xf32, #tpu.memory_space<vmem>>, vector<8x1xf32>
      %32 = arith.mulf %12, %12 : vector<8x128xf32>
      %cst_20 = arith.constant dense<0.000000e+00> : vector<8xf32>
      %33 = vector.multi_reduction <add>, %32, %cst_20 [1] : vector<8x128xf32> to vector<8xf32>
      %34 = vector.shape_cast %33 : vector<8xf32> to vector<8x1xf32>
      %35 = arith.addf %31, %34 : vector<8x1xf32>
      %36 = arith.index_cast %29 : i32 to index
      %c0_21 = arith.constant 0 : index
      %37 = vector.load %arg7[%36, %c0_21] : memref<8x1xf32, #tpu.memory_space<vmem>>, vector<8x1xf32>
      tpu.vector_store %arg7[%36, %c0_21], %35 {strides = array<i32>} : memref<8x1xf32, #tpu.memory_space<vmem>>, vector<8x1xf32>,
    } else {
    }
    %c0_i32_9 = arith.constant 0 : i32
    %16 = arith.cmpi eq, %arg2, %c0_i32_9 : i32
    %17 = arith.extui %16 : i1 to i32
    %c0_i32_10 = arith.constant 0 : i32
    %18 = arith.cmpi ne, %17, %c0_i32_10 : i32
    scf.if %18 {
      %cst_19 = arith.constant 0.000000e+00 : f32
      %28 = vector.broadcast %cst_19 : f32 to vector<8x8xf32>
      %c0_20 = arith.constant 0 : index
      %c0_21 = arith.constant 0 : index
      %29 = vector.load %arg6[%c0_20, %c0_21] : memref<8x8xf32, #tpu.memory_space<vmem>>, vector<8x8xf32>
      tpu.vector_store %arg6[%c0_20, %c0_21], %28 {strides = array<i32>} : memref<8x8xf32, #tpu.memory_space<vmem>>, vector<8x8xf32>,
    } else {
    }
    %c0_11 = arith.constant 0 : index
    %c0_12 = arith.constant 0 : index
    %19 = vector.load %arg3[%c0_11, %c0_12] : memref<8x128xf32, #tpu.memory_space<vmem>>, vector<8x128xf32>
    %c0_13 = arith.constant 0 : index
    %c0_14 = arith.constant 0 : index
    %20 = vector.load %arg6[%c0_13, %c0_14] : memref<8x8xf32, #tpu.memory_space<vmem>>, vector<8x8xf32>
    %cst = arith.constant dense<0.000000e+00> : vector<8x8xf32>
    %21 = tpu.matmul %19, %12, %cst {dimension_numbers = #tpu.dot_dimension_numbers<[1], [1], [0], [0], [0, 0, 1, 0], [], []>} : vector<8x128xf32>, vector<8x128xf32>, vector<8x8xf32> -> vector<8x8xf32>
    %22 = arith.addf %20, %21 : vector<8x8xf32>
    %c0_15 = arith.constant 0 : index
    %c0_16 = arith.constant 0 : index
    %23 = vector.load %arg6[%c0_15, %c0_16] : memref<8x8xf32, #tpu.memory_space<vmem>>, vector<8x8xf32>
    tpu.vector_store %arg6[%c0_15, %c0_16], %22 {strides = array<i32>} : memref<8x8xf32, #tpu.memory_space<vmem>>, vector<8x8xf32>,
    %24 = arith.extui %5 : i1 to i32
    %c0_i32_17 = arith.constant 0 : i32
    %25 = arith.cmpi ne, %24, %c0_i32_17 : i32
    scf.if %25 {
      %c0_19 = arith.constant 0 : index
      %c0_20 = arith.constant 0 : index
      %28 = vector.load %arg6[%c0_19, %c0_20] : memref<8x8xf32, #tpu.memory_space<vmem>>, vector<8x8xf32>
      %c8_i32 = arith.constant 8 : i32
      %29 = arith.muli %arg0, %c8_i32 : i32
      %30 = tpu.assume_multiple %29, 8 : i32
      %c8_i32_21 = arith.constant 8 : i32
      %31 = arith.muli %arg1, %c8_i32_21 : i32
      %32 = tpu.assume_multiple %31, 8 : i32
      %33 = arith.index_cast %30 : i32 to index
      %c0_22 = arith.constant 0 : index
      %34 = vector.load %arg7[%33, %c0_22] : memref<8x1xf32, #tpu.memory_space<vmem>>, vector<8x1xf32>
      %cst_23 = arith.constant 1.000000e-30 : f32
      %35 = vector.broadcast %cst_23 : f32 to vector<8x1xf32>
      %36 = arith.maximumf %34, %35 : vector<8x1xf32>
      %37 = math.rsqrt %36 : vector<8x1xf32>
      %38 = arith.index_cast %32 : i32 to index
      %c0_24 = arith.constant 0 : index
      %39 = vector.load %arg7[%38, %c0_24] : memref<8x1xf32, #tpu.memory_space<vmem>>, vector<8x1xf32>
      %cst_25 = arith.constant 1.000000e-30 : f32
      %40 = vector.broadcast %cst_25 : f32 to vector<8x1xf32>
      %41 = arith.maximumf %39, %40 : vector<8x1xf32>
      %42 = math.rsqrt %41 : vector<8x1xf32>
      %43 = tpu.iota {dimensions = array<i32: 0>} : vector<8x8xi32>
      %44 = tpu.iota {dimensions = array<i32: 1>} : vector<8x8xi32>
      %45 = arith.cmpi eq, %43, %44 : vector<8x8xi32>
      %46 = arith.extui %45 : vector<8x8xi1> to vector<8x8xi32>
      %47 = arith.sitofp %46 : vector<8x8xi32> to vector<8x8xf32>
      %48 = vector.broadcast %42 : vector<8x1xf32> to vector<8x8xf32>
      %49 = arith.mulf %48, %47 : vector<8x8xf32>
      %50 = vector.broadcast %37 : vector<8x1xf32> to vector<8x8xf32>
      %51 = arith.mulf %28, %50 : vector<8x8xf32>
      %cst_26 = arith.constant dense<0.000000e+00> : vector<8x8xf32>
      %52 = tpu.matmul %51, %49, %cst_26 {dimension_numbers = #tpu.dot_dimension_numbers<[1], [0], [0], [1], [0, 0, 1, 1], [], []>} : vector<8x8xf32>, vector<8x8xf32>, vector<8x8xf32> -> vector<8x8xf32>
      %c0_27 = arith.constant 0 : index
      %c0_28 = arith.constant 0 : index
      %53 = vector.load %arg10[%c0_27, %c0_28] : memref<1x1xf32, #tpu.memory_space<vmem>>, vector<1x1xf32>
      %54 = vector.shape_cast %52 : vector<8x8xf32> to vector<1x8x8xf32>
      %cst_29 = arith.constant dense<0xFF800000> : vector<1xf32>
      %55 = vector.multi_reduction <maximumf>, %54, %cst_29 [1, 2] : vector<1x8x8xf32> to vector<1xf32>
      %56 = vector.shape_cast %55 : vector<1xf32> to vector<1x1x1xf32>
      %57 = vector.extract %56[0, 0, 0] : f32 from vector<1x1x1xf32>
      %58 = vector.broadcast %57 : f32 to vector<1x1xf32>
      %59 = arith.maximumf %53, %58 : vector<1x1xf32>
      %c0_30 = arith.constant 0 : index
      %c0_31 = arith.constant 0 : index
      %60 = vector.load %arg10[%c0_30, %c0_31] : memref<1x1xf32, #tpu.memory_space<vmem>>, vector<1x1xf32>
      tpu.vector_store %arg10[%c0_30, %c0_31], %59 {strides = array<i32>} : memref<1x1xf32, #tpu.memory_space<vmem>>, vector<1x1xf32>,
      %c0_32 = arith.constant 0 : index
      %c0_33 = arith.constant 0 : index
      %61 = vector.load %arg8[%c0_32, %c0_33] : memref<1x1xf32, #tpu.memory_space<vmem>>, vector<1x1xf32>
      %62 = arith.mulf %52, %52 : vector<8x8xf32>
      %63 = vector.shape_cast %62 : vector<8x8xf32> to vector<1x8x8xf32>
      %cst_34 = arith.constant dense<0.000000e+00> : vector<1xf32>
      %64 = vector.multi_reduction <add>, %63, %cst_34 [1, 2] : vector<1x8x8xf32> to vector<1xf32>
      %65 = vector.shape_cast %64 : vector<1xf32> to vector<1x1x1xf32>
      %66 = vector.extract %65[0, 0, 0] : f32 from vector<1x1x1xf32>
      %67 = vector.broadcast %66 : f32 to vector<1x1xf32>
      %68 = arith.addf %61, %67 : vector<1x1xf32>
      %c0_35 = arith.constant 0 : index
      %c0_36 = arith.constant 0 : index
      %69 = vector.load %arg8[%c0_35, %c0_36] : memref<1x1xf32, #tpu.memory_space<vmem>>, vector<1x1xf32>
      tpu.vector_store %arg8[%c0_35, %c0_36], %68 {strides = array<i32>} : memref<1x1xf32, #tpu.memory_space<vmem>>, vector<1x1xf32>,
      %c8_i32_37 = arith.constant 8 : i32
      %70 = arith.muli %arg0, %c8_i32_37 : i32
      %71 = vector.broadcast %70 : i32 to vector<8x8xi32>
      %72 = arith.addi %43, %71 : vector<8x8xi32>
      %c8_i32_38 = arith.constant 8 : i32
      %73 = arith.muli %arg1, %c8_i32_38 : i32
      %74 = vector.broadcast %73 : i32 to vector<8x8xi32>
      %75 = arith.addi %44, %74 : vector<8x8xi32>
      %76 = arith.cmpi eq, %72, %75 : vector<8x8xi32>
      %77 = arith.extui %76 : vector<8x8xi1> to vector<8x8xi32>
      %78 = arith.sitofp %77 : vector<8x8xi32> to vector<8x8xf32>
      %c0_39 = arith.constant 0 : index
      %c0_40 = arith.constant 0 : index
      %79 = vector.load %arg9[%c0_39, %c0_40] : memref<1x1xf32, #tpu.memory_space<vmem>>, vector<1x1xf32>
      %80 = arith.mulf %52, %78 : vector<8x8xf32>
      %81 = vector.shape_cast %80 : vector<8x8xf32> to vector<1x8x8xf32>
      %cst_41 = arith.constant dense<0.000000e+00> : vector<1xf32>
      %82 = vector.multi_reduction <add>, %81, %cst_41 [1, 2] : vector<1x8x8xf32> to vector<1xf32>
      %83 = vector.shape_cast %82 : vector<1xf32> to vector<1x1x1xf32>
      %84 = vector.extract %83[0, 0, 0] : f32 from vector<1x1x1xf32>
      %85 = vector.broadcast %84 : f32 to vector<1x1xf32>
      %86 = arith.addf %79, %85 : vector<1x1xf32>
      %c0_42 = arith.constant 0 : index
      %c0_43 = arith.constant 0 : index
      %87 = vector.load %arg9[%c0_42, %c0_43] : memref<1x1xf32, #tpu.memory_space<vmem>>, vector<1x1xf32>
      tpu.vector_store %arg9[%c0_42, %c0_43], %86 {strides = array<i32>} : memref<1x1xf32, #tpu.memory_space<vmem>>, vector<1x1xf32>,
    } else {
    }
    %26 = arith.extui %9 : i1 to i32
    %c0_i32_18 = arith.constant 0 : i32
    %27 = arith.cmpi ne, %26, %c0_i32_18 : i32
    scf.if %27 {
      %c0_19 = arith.constant 0 : index
      %c0_20 = arith.constant 0 : index
      %28 = vector.load %arg10[%c0_19, %c0_20] : memref<1x1xf32, #tpu.memory_space<vmem>>, vector<1x1xf32>
      %cst_21 = arith.constant 1.000000e+00 : f32
      %29 = vector.broadcast %cst_21 : f32 to vector<1x1xf32>
      %30 = arith.divf %29, %28 : vector<1x1xf32>
      %c0_22 = arith.constant 0 : index
      %c0_23 = arith.constant 0 : index
      %31 = vector.load %arg8[%c0_22, %c0_23] : memref<1x1xf32, #tpu.memory_space<vmem>>, vector<1x1xf32>
      %32 = arith.mulf %31, %30 : vector<1x1xf32>
      %33 = arith.mulf %32, %30 : vector<1x1xf32>
      %c0_24 = arith.constant 0 : index
      %c0_25 = arith.constant 0 : index
      %34 = vector.load %arg9[%c0_24, %c0_25] : memref<1x1xf32, #tpu.memory_space<vmem>>, vector<1x1xf32>
      %cst_26 = arith.constant 2.000000e+00 : f32
      %35 = vector.broadcast %cst_26 : f32 to vector<1x1xf32>
      %36 = arith.mulf %35, %34 : vector<1x1xf32>
      %37 = arith.mulf %36, %30 : vector<1x1xf32>
      %38 = arith.subf %33, %37 : vector<1x1xf32>
      %cst_27 = arith.constant 8.000000e+00 : f32
      %39 = vector.broadcast %cst_27 : f32 to vector<1x1xf32>
      %40 = arith.addf %38, %39 : vector<1x1xf32>
      %cst_28 = arith.constant 6.400000e+01 : f32
      %41 = vector.broadcast %cst_28 : f32 to vector<1x1xf32>
      %42 = arith.divf %40, %41 : vector<1x1xf32>
      %c0_29 = arith.constant 0 : index
      %c0_30 = arith.constant 0 : index
      %43 = vector.load %arg5[%c0_29, %c0_30] : memref<1x1xf32, #tpu.memory_space<vmem>>, vector<1x1xf32>
      tpu.vector_store %arg5[%c0_29, %c0_30], %42 {strides = array<i32>} : memref<1x1xf32, #tpu.memory_space<vmem>>, vector<1x1xf32>,
    } else {
    }
    return
  }
  func.func @transform_0(%arg0: i32, %arg1: i32, %arg2: i32) -> (i32, i32) {
    %c0_i32 = arith.constant 0 : i32
    return %arg0, %arg2 : i32, i32
  }
  func.func @transform_1(%arg0: i32, %arg1: i32, %arg2: i32) -> (i32, i32) {
    %c0_i32 = arith.constant 0 : i32
    return %arg1, %arg2 : i32, i32
  }
  func.func @transform_2(%arg0: i32, %arg1: i32, %arg2: i32) -> (i32, i32) {
    %c0_i32 = arith.constant 0 : i32
    %c0_i32_0 = arith.constant 0 : i32
    %c0_i32_1 = arith.constant 0 : i32
    return %c0_i32, %c0_i32_0 : i32, i32
  }
}

</mosaic_0001>

<bundles_post_ra>
// kernel: tpu_custom_call.1
= control target key start
LH: loop header
LB: loop body
LE: loop exit
PB: predicated region body
PF: predicated region fallthrough
CT: control target
= control target key end

     0   :  { %7 = vsyncpa [#allocation8], 0  ;;  %s426_s0 = inlined_call_operand.hbm [shape: f32[8,128], index: 0, kind: input, shape index: {}]   ;;  %s427_s1 = inlined_call_operand.hbm [shape: f32[8,128], index: 1, kind: input, shape index: {}]   ;;  %s428_s2 = inlined_call_operand.hbm [shape: f32[1,1], index: 2, kind: output, shape index: {}]  }
   0x1   :  { %8 = vsyncpa [#allocation11], 0 }
   0x2   :  { %9 = vsyncpa [#allocation9], 0  ;;  %s15_s11 = sshll.u32 %s426_s0, 4  ;;  %s380_s12 = smov [#allocation7]   ;;  %s16_s11 = int_to_ptr.hbm [resolvable:$true] %s15_s11 }
   0x3   :  { %s17_s13 = sshll.u32 %s380_s12, 4  ;;  %s26_s16 = sshll.u32 %s427_s1, 4  ;;  %s18_s13 = int_to_ptr.vmem [resolvable:$true] %s17_s13  ;;  %s27_s16 = int_to_ptr.hbm [resolvable:$true] %s26_s16 }
   0x4   :  { %20 = dma.hbm_to_vmem [thread:$0]  %s16_s11, 128, %s18_s13, [#allocation8]  }
   0x5   :  { %s381_s17 = smov [#allocation10]  }
   0x6   :  { %s28_s18 = sshll.u32 %s381_s17, 4  ;;  %s29_s18 = int_to_ptr.vmem [resolvable:$true] %s28_s18 }
   0x7   :  { %31 = dma.hbm_to_vmem [thread:$0]  %s27_s16, 128, %s29_s18, [#allocation11]  }
   0x8   :  { %374 = dma.done.wait [#allocation8], 128  }
   0x9   :  { %375 = vsyncadd [#allocation8], 4294967168 }
   0xa   :  { %376 = dma.done.wait [#allocation11], 128  }
   0xb   :  { %377 = vsyncadd [#allocation11], 4294967168  ;;  %vm49_vm0 = vcmask 7168   ;;  %v382_v0 = vmov 0.0   ;;  %v55_v1 = vld [vmem:[#allocation10] sm:$0xff]  ;;  %v73_v3 = vld [vmem:[#allocation7] sm:$0xff]  ;;  %v130_v20 = vlaneseq }
   0xc   :  { %50 = vst.msk [vmem:[#allocation3] sm:$0xff] %vm49_vm0, %v382_v0  ;;  %v62_v2 = vmul.f32 %v55_v1, %v55_v1  ;;  %90 = vmatpush.xpose.msra.mxu0 %v55_v1  ;;  %v383_v4 = vmov 0   ;;  %vm71_vm1 = vcmask 64512   ;;  %vm51_vm6 = vcmask 0   ;;  %s386_s20 = smov [#allocation12]   ;;  %s267_s24 = sshll.u32 %s428_s2, 4  ;;  %s268_s24 = int_to_ptr.hbm [resolvable:$true] %s267_s24 }
   0xd   :  { %295 = vset.pattern.permute.xlu1 %v383_v4  ;;  %294 = vset.pattern.permute.xlu0 %v383_v4  ;;  %72 = vst.msk [vmem:[#allocation2] sm:$0xff] %vm71_vm1, %v382_v0  ;;  %v131_v21 = vshrl.u32 %v130_v20, 7  ;;  %v133_v22 = vand.u32 127, %v130_v20  ;;  %v384_v35 = vmov -inf   ;;  %s265_s21 = sshll.u32 %s386_s20, 4  ;;  %s266_s21 = int_to_ptr.vmem [resolvable:$true] %s265_s21 }
   0xe   :  { %63 = vadd.xlane.f32.xlu0 %v62_v2  ;;  %54 = vst.msk [vmem:[#allocation6] sm:$0x1] %vm51_vm6, %v384_v35 }
   0xf   :  { %91 = vmatmul.f32.vlgmr.msra.gmra.mxu0 %v73_v3  ;;  %vm134_vm5 = vcmp.eq.s32.totalorder %v131_v21, %v133_v22  ;;  %52 = vst.msk [vmem:[#allocation4] sm:$0x1] %vm51_vm6, %v382_v0 }
  0x10   :  { %v278_v24 = vsel %vm134_vm5, 1.0, %v382_v0  ;;  %53 = vst.msk [vmem:[#allocation5] sm:$0x1] %vm51_vm6, %v382_v0  ;;  %v385_v0 = vmov 64.0  }
  0x13   :  { %v61_v5 = vld [vmem:[#allocation3] sm:$0xff] }
  0x14   :  { %v74_v17 = vld [vmem:[#allocation2] sm:$0xff] }
  0x15   :  { %v172_v57 = vld [vmem:[#allocation6] sm:$0x1] }
  0x16   :  { %v187_v59 = vld [vmem:[#allocation4] sm:$0x1] }
  0x17   :  { %v209_v63 = vld [vmem:[#allocation5] sm:$0x1] }
  0x81   :  { %v64_v6 = vpop.xlane.xlu0 %63 }
  0x82   :  { %v65_v7 = vadd.f32 %v64_v6, %v61_v5 }
  0x84   :  { %67 = vst.msk [vmem:[#allocation3] sm:$0xff] %vm49_vm0, %v65_v7 }
  0x8b   :  { %v118_v8 = vld [vmem:[#allocation3] sm:$0xff] }
  0x8c   :  { %v119_v9 = vmax.f32 %v118_v8, 1e-30  ;;  %v92_v18 = vpop.f32.mrf.mxu0 }
  0x8d   :  { %v95_v19 = vadd.f32 %v92_v18, %v74_v17 }
  0x8e   :  { %296 = vrsqrt.f32 %v119_v9  ;;  %vm126_vm3 = vweird.f32 %v119_v9 }
  0x8f   :  { %97 = vst.msk [vmem:[#allocation2] sm:$0xff] %vm71_vm1, %v95_v19  ;;  %298 = vrcp.f32 %v385_v0 }
  0x94   :  { %v297_v10 = vpop.eup %296 }
  0x95   :  { %v121_v11 = vmul.f32 %v297_v10, %v119_v9  ;;  %vm127_vm2 = vweird.f32 %v297_v10  ;;  %v299_v4 = vpop.eup %298 }
  0x96   :  { %vm128_vm4 = vmor %vm126_vm3, %vm127_vm2  ;;  %v101_v23 = vld [vmem:[#allocation2] sm:$0xff]  ;;  %v251_v6 = vmul.f32 64.0, %v299_v4  ;;  %vm255_vm11 = vweird.f32 %v299_v4 }
  0x97   :  { %v122_v12 = vmul.f32 %v297_v10, %v121_v11 }
  0x99   :  { %v123_v13 = vmul.f32 0.5, %v122_v12 }
  0x9b   :  { %v124_v14 = vsub.f32 1.5, %v123_v13 }
  0x9d   :  { %v125_v15 = vmul.f32 %v297_v10, %v124_v14 }
  0x9f   :  { %v129_v16 = vsel %vm128_vm4, %v297_v10, %v125_v15  ;;  %v252_v10 = vsub.f32 1.0, %v251_v6 }
  0xa0   :  { %139 = vperm.xlu0 %294, %v129_v16   ;;  %145 = vperm.xlu1 %295, %v129_v16  }
  0xa1   :  { %v253_v16 = vmul.f32 %v299_v4, %v252_v10 }
  0xa3   :  { %v254_v22 = vadd.f32 %v299_v4, %v253_v16 }
 0x112   :  { %v140_v25 = vpop.permute.xlu0 %139  ;;  %v146_v26 = vpop.permute.xlu1 %145 }
 0x113   :  { %v148_v27 = vmul.f32 %v146_v26, %v101_v23  ;;  %v142_v28 = vmul.f32 %v278_v24, %v140_v25  ;;  %v256_v26 = vsel %vm255_vm11, %v299_v4, %v254_v22 }
 0x115   :  { %167 = vmatpush.msra.mxu1 %v142_v28 }
 0x116   :  { %279 = vmatmul.msk.f32.vlgmr.msra.gmra.mxu1 %vm71_vm1, %v148_v27 }
 0x193   :  { %v169_v29 = vpop.f32.mrf.mxu1 }
 0x194   :  { %v173_v30 = vsel %vm71_vm1, %v169_v29, -inf  ;;  %v188_v31 = vmul.f32 %v169_v29, %v169_v29  ;;  %v210_v33 = vmul.f32 %v278_v24, %v169_v29 }
 0x195   :  { %174 = vmax.xlane.f32.xlu1 %v173_v30 }
 0x196   :  { %v189_v32 = vsel %vm71_vm1, %v188_v31, 0.0  ;;  %v211_v34 = vsel %vm71_vm1, %v210_v33, 0.0 }
 0x197   :  { %190 = vadd.xlane.f32.xlu2 %v189_v32 }
 0x19f   :  { %212 = vadd.xlane.f32.xlu2 %v211_v34 }
 0x208   :  { %v175_v36 = vpop.xlane.xlu1 %174 }
 0x209   :  { %v176_v37 = vrot.slane %v175_v36, 4 }
 0x20a   :  { %v191_v38 = vpop.xlane.xlu2 %190 }
 0x20b   :  { %v177_v39 = vmax.f32 %v175_v36, %v176_v37  ;;  %v192_v40 = vrot.slane %v191_v38, 4 }
 0x20d   :  { %v178_v41 = vrot.slane %v177_v39, 2  ;;  %v193_v42 = vadd.f32 %v192_v40, %v191_v38 }
 0x20f   :  { %v194_v43 = vrot.slane %v193_v42, 2  ;;  %v179_v44 = vmax.f32 %v177_v39, %v178_v41 }
 0x211   :  { %v180_v45 = vrot.slane %v179_v44, 1  ;;  %v195_v46 = vadd.f32 %v194_v43, %v193_v42 }
 0x212   :  { %v213_v47 = vpop.xlane.xlu2 %212 }
 0x213   :  { %v214_v48 = vrot.slane %v213_v47, 4  ;;  %v181_v49 = vmax.f32 %v179_v44, %v180_v45  ;;  %v196_v50 = vrot.slane %v195_v46, 1 }
 0x215   :  { %v215_v51 = vadd.f32 %v214_v48, %v213_v47  ;;  %281 = vpush %v181_v49  ;;  %v197_v52 = vadd.f32 %v196_v50, %v195_v46 }
 0x217   :  { %v216_v53 = vrot.slane %v215_v51, 2  ;;  %283 = vpush %v197_v52 }
 0x219   :  { %v217_v54 = vadd.f32 %v216_v53, %v215_v51 }
 0x21b   :  { %v218_v55 = vrot.slane %v217_v54, 1 }
 0x21d   :  { %v219_v56 = vadd.f32 %v218_v55, %v217_v54 }
 0x21f   :  { %285 = vpush %v219_v56 }
 0x246   :  { %s282_s0 = spop %281 }
 0x247   :  { %v183_v58 = vstv %s282_s0 }
 0x248   :  { %v184_v60 = vmax.f32 %v172_v57, %v183_v58  ;;  %s284_s1 = spop %283 }
 0x249   :  { %v199_v61 = vstv %s284_s1 }
 0x24a   :  { %186 = vst.msk [vmem:[#allocation6] sm:$0x1] %vm51_vm6, %v184_v60  ;;  %v200_v62 = vadd.f32 %v199_v61, %v187_v59 }
 0x24c   :  { %201 = vst.msk [vmem:[#allocation4] sm:$0x1] %vm51_vm6, %v200_v62 }
 0x250   :  { %s286_s19 = spop %285 }
 0x251   :  { %v221_v1 = vstv %s286_s19  ;;  %v226_v2 = vld [vmem:[#allocation6] sm:$0x1] }
 0x252   :  { %v222_v3 = vadd.f32 %v221_v1, %v209_v63  ;;  %300 = vrcp.f32 %v226_v2  ;;  %v238_v9 = vand.u32 2147483648, %v226_v2  ;;  %v236_v12 = vand.u32 2147483647, %v226_v2 }
 0x253   :  { %vm232_vm8 = vweird.f32 %v226_v2  ;;  %v242_v19 = vld [vmem:[#allocation4] sm:$0x1] }
 0x254   :  { %223 = vst.msk [vmem:[#allocation5] sm:$0x1] %vm51_vm6, %v222_v3  ;;  %v239_v14 = vor.u32 1.1754944e-38, %v238_v9  ;;  %vm237_vm10 = vcmp.eq.f32.partialorder %v236_v12, 8.507059e+37 }
 0x258   :  { %v301_v5 = vpop.eup %300 }
 0x259   :  { %v228_v7 = vmul.f32 %v301_v5, %v226_v2  ;;  %vm233_vm7 = vweird.f32 %v301_v5 }
 0x25a   :  { %vm234_vm9 = vmor %vm232_vm8, %vm233_vm7 }
 0x25b   :  { %v229_v8 = vsub.f32 1.0, %v228_v7  ;;  %v245_v15 = vld [vmem:[#allocation5] sm:$0x1] }
 0x25c   :  { %v246_v21 = vmul.f32 2.0, %v245_v15 }
 0x25d   :  { %v230_v11 = vmul.f32 %v301_v5, %v229_v8 }
 0x25f   :  { %v231_v13 = vadd.f32 %v301_v5, %v230_v11 }
 0x261   :  { %v235_v17 = vsel %vm234_vm9, %v301_v5, %v231_v13 }
 0x262   :  { %v240_v18 = vsel %vm237_vm10, %v239_v14, %v235_v17 }
 0x263   :  { %v243_v20 = vmul.f32 %v242_v19, %v240_v18  ;;  %v247_v24 = vmul.f32 %v246_v21, %v240_v18 }
 0x265   :  { %v244_v23 = vmul.f32 %v243_v20, %v240_v18 }
 0x267   :  { %v248_v25 = vsub.f32 %v244_v23, %v247_v24 }
 0x269   :  { %v249_v27 = vadd.f32 8.0, %v248_v25 }
 0x26b   :  { %v257_v28 = vmul.f32 %v256_v26, %v249_v27 }
 0x26d   :  { %259 = vst.msk [vmem:[#allocation12] sm:$0x1] %vm51_vm6, %v257_v28 }
 0x26e   :  { %270 = dma.vmem_to_hbm [thread:$0]  %s266_s21, 16, %s268_s24, [#allocation9]  }
 0x26f   :  { %378 = dma.done.wait [#allocation9], 16  }
 0x270   :  { %379 = vsyncadd [#allocation9], 4294967280 }
 0x271   :  { %275 = vsyncpa [#allocation8], 1 }
 0x272   :  { %276 = vsyncpa [#allocation11], 1 }
 0x273   :  { %277 = vsyncpa [#allocation9], 1 }

</bundles_post_ra>
